<compile_context>
chip_gen: v6e
topology: v6e:2x2x1
jax: 0.10.0
libtpu: 0.0.40
codegen_flags: <defaults>
</compile_context>

<pallas_src>
import functools

import jax
import jax.numpy as jnp
from jax.experimental import pallas as pl
from jax.experimental.pallas import tpu as pltpu


def _softplus(x):
    # torch.nn.Softplus(beta=1, threshold=20): x if x > 20 else log1p(exp(x)).
    # exp() of the discarded branch may be inf but never NaN, so the select is safe.
    return jnp.where(x > 20.0, x, jnp.log1p(jnp.exp(x)))


def _a2c_kernel(x_ref, wf_ref, bf_ref, w1_ref, b1_ref, w2_ref, b2_ref,
                out_ref, *, out_dim):
    x = x_ref[...]

    # features = ReLU(x @ Wf + bf)                                  (B, 256)
    h = jnp.dot(x, wf_ref[...], preferred_element_type=jnp.float32) + bf_ref[...]
    h = jnp.maximum(h, 0.0)

    # all three head hidden layers in one matmul: ReLU(h @ W1 + b1) (B, 384)
    a = jnp.dot(h, w1_ref[...], preferred_element_type=jnp.float32) + b1_ref[...]
    a = jnp.maximum(a, 0.0)

    # block-diagonal second layer: lane-dense packed logits          (B, 128)
    z = jnp.dot(a, w2_ref[...], preferred_element_type=jnp.float32) + b2_ref[...]

    # per-lane activation: tanh for mu lanes, softplus for var lanes, identity
    # for the value lane (and the zero padding lanes).
    col = jax.lax.broadcasted_iota(jnp.int32, z.shape, 1)
    out_ref[...] = jnp.where(col < out_dim, jnp.tanh(z),
                             jnp.where(col < 2 * out_dim, _softplus(z), z))


def fuse_params(p, out_dim, lane_pad=128):
    """Host-side, one-time fusion of the three head weights."""
    half = p["wmu2"].shape[0]
    assert 2 * out_dim + 1 <= lane_pad

    w1 = jnp.concatenate([p["wmu1"], p["wv1"], p["wc1"]], axis=1)   # (256, 384)
    b1 = jnp.concatenate([p["bmu1"], p["bv1"], p["bc1"]], axis=1)   # (1, 384)

    w2 = jnp.zeros((3 * half, lane_pad), jnp.float32)               # (384, 128)
    w2 = w2.at[0:half, 0:out_dim].set(p["wmu2"])
    w2 = w2.at[half:2 * half, out_dim:2 * out_dim].set(p["wv2"])
    w2 = w2.at[2 * half:3 * half, 2 * out_dim:2 * out_dim + 1].set(p["wc2"])

    b2 = jnp.zeros((1, lane_pad), jnp.float32)
    b2 = b2.at[:, 0:out_dim].set(p["bmu2"])
    b2 = b2.at[:, out_dim:2 * out_dim].set(p["bv2"])
    b2 = b2.at[:, 2 * out_dim:2 * out_dim + 1].set(p["bc2"])

    return {"wf": p["wf"], "bf": p["bf"], "w1": w1, "b1": b1, "w2": w2, "b2": b2}


def a2c_forward(state, fused, out_dim):
    """state: (B, input_dim) f32. fused: output of fuse_params."""
    B = state.shape[0]
    lane_pad = fused["w2"].shape[1]

    args = (state,
            fused["wf"], fused["bf"],
            fused["w1"], fused["b1"],
            fused["w2"], fused["b2"])

    # Whole arrays fit comfortably in VMEM (~0.6 MiB of weights): single grid
    # point, full-array blocks.  NOTE: the index_map lambdas bind each arg's
    # rank via a default argument (no late-binding closure bug).
    in_specs = [pl.BlockSpec(a.shape, lambda _a=a: (0,) * _a.ndim) for a in args]
    out_spec = pl.BlockSpec((B, lane_pad), lambda: (0, 0))

    # TODO(synk): for large rollout batches, tile B over a "parallel" grid axis
    # so v7x's second TensorCore shares the work; pointless at B=8.
    packed = pl.pallas_call(
        functools.partial(_a2c_kernel, out_dim=out_dim),
        grid=(),
        in_specs=in_specs,
        out_specs=out_spec,
        out_shape=jax.ShapeDtypeStruct((B, lane_pad), jnp.float32),
    )(*args)

    mu = packed[:, 0:out_dim]
    var = packed[:, out_dim:2 * out_dim]
    value = packed[:, 2 * out_dim:2 * out_dim + 1]
    return mu, var, value


def _xavier_uniform(key, fan_in, fan_out):
    bound = jnp.sqrt(6.0 / (fan_in + fan_out))
    # Stored as (in, out): equivalent to xavier_uniform on torch's (out, in), transposed.
    return jax.random.uniform(key, (fan_in, fan_out), jnp.float32, -bound, bound)


def _bias_init(key, fan_in, fan_out):
    # PyTorch Linear default bias init: U(-1/sqrt(fan_in), 1/sqrt(fan_in)).
    bound = 1.0 / jnp.sqrt(jnp.float32(fan_in))
    return jax.random.uniform(key, (1, fan_out), jnp.float32, -bound, bound)


def init_params(key, input_dim, outputs_count, hidden_count=256):
    half = hidden_count // 2
    keys = jax.random.split(key, 14)
    p = {}
    p["wf"] = _xavier_uniform(keys[0], input_dim, hidden_count)
    p["bf"] = _bias_init(keys[1], input_dim, hidden_count)

    p["wmu1"] = _xavier_uniform(keys[2], hidden_count, half)
    p["bmu1"] = _bias_init(keys[3], hidden_count, half)
    p["wmu2"] = _xavier_uniform(keys[4], half, outputs_count)
    p["bmu2"] = _bias_init(keys[5], half, outputs_count)

    p["wv1"] = _xavier_uniform(keys[6], hidden_count, half)
    p["bv1"] = _bias_init(keys[7], hidden_count, half)
    p["wv2"] = _xavier_uniform(keys[8], half, outputs_count)
    p["bv2"] = _bias_init(keys[9], half, outputs_count)

    p["wc1"] = _xavier_uniform(keys[10], hidden_count, half)
    p["bc1"] = _bias_init(keys[11], hidden_count, half)
    p["wc2"] = _xavier_uniform(keys[12], half, 1)
    p["bc2"] = _bias_init(keys[13], half, 1)
    return p


def reference_forward(state, p):
    h = jnp.maximum(state @ p["wf"] + p["bf"], 0.0)
    a = jnp.maximum(h @ p["wmu1"] + p["bmu1"], 0.0)
    mu = jnp.tanh(a @ p["wmu2"] + p["bmu2"])
    v = jnp.maximum(h @ p["wv1"] + p["bv1"], 0.0)
    var = _softplus(v @ p["wv2"] + p["bv2"])
    c = jnp.maximum(h @ p["wc1"] + p["bc1"], 0.0)
    val = c @ p["wc2"] + p["bc2"]
    return mu, var, val


if __name__ == "__main__":
    import numpy as np

    key = jax.random.PRNGKey(0)
    k_param, k_state = jax.random.split(key)

    batch = 8
    input_dim = 17        # HalfCheetah observation dim
    outputs_count = 6     # HalfCheetah action dim
    hidden_count = 256

    params = init_params(k_param, input_dim, outputs_count, hidden_count)
    fused = fuse_params(params, outputs_count)          # one-time host-side fusion
    state = jax.random.normal(k_state, (batch, input_dim), jnp.float32)

    mu, var, value = a2c_forward(state, fused, outputs_count)
    jax.block_until_ready((mu, var, value))

    mu_r, var_r, val_r = reference_forward(state, params)
    np.testing.assert_allclose(np.asarray(mu), np.asarray(mu_r), rtol=1e-5, atol=1e-5)
    np.testing.assert_allclose(np.asarray(var), np.asarray(var_r), rtol=1e-5, atol=1e-5)
    np.testing.assert_allclose(np.asarray(value), np.asarray(val_r), rtol=1e-5, atol=1e-5)

    assert mu.shape == (batch, outputs_count)
    assert var.shape == (batch, outputs_count)
    assert value.shape == (batch, 1)

    print("KERNEL_OK")
</pallas_src>

<mosaic_0001>
module attributes {stable_mosaic.version = 11 : i64} {
  func.func @_a2c_kernel(%arg0: memref<8x17xf32, #tpu.memory_space<vmem>>, %arg1: memref<17x256xf32, #tpu.memory_space<vmem>>, %arg2: memref<1x256xf32, #tpu.memory_space<vmem>>, %arg3: memref<256x384xf32, #tpu.memory_space<vmem>>, %arg4: memref<1x384xf32, #tpu.memory_space<vmem>>, %arg5: memref<384x128xf32, #tpu.memory_space<vmem>>, %arg6: memref<1x128xf32, #tpu.memory_space<vmem>>, %arg7: memref<8x128xf32, #tpu.memory_space<vmem>>) attributes {dimension_semantics = [], scalar_prefetch = 0 : i64, scratch_operands = 0 : i64, tpu.core_type = #tpu.core_type<tc>} {
    %c0 = arith.constant 0 : index
    %c0_0 = arith.constant 0 : index
    %0 = vector.load %arg0[%c0, %c0_0] : memref<8x17xf32, #tpu.memory_space<vmem>>, vector<8x17xf32>
    %c0_1 = arith.constant 0 : index
    %c0_2 = arith.constant 0 : index
    %1 = vector.load %arg1[%c0_1, %c0_2] : memref<17x256xf32, #tpu.memory_space<vmem>>, vector<17x256xf32>
    %cst = arith.constant dense<0.000000e+00> : vector<8x256xf32>
    %2 = tpu.matmul %0, %1, %cst {dimension_numbers = #tpu.dot_dimension_numbers<[1], [0], [0], [1], [0, 0, 1, 1], [], []>} : vector<8x17xf32>, vector<17x256xf32>, vector<8x256xf32> -> vector<8x256xf32>
    %c0_3 = arith.constant 0 : index
    %c0_4 = arith.constant 0 : index
    %3 = vector.load %arg2[%c0_3, %c0_4] : memref<1x256xf32, #tpu.memory_space<vmem>>, vector<1x256xf32>
    %4 = vector.broadcast %3 : vector<1x256xf32> to vector<8x256xf32>
    %5 = arith.addf %2, %4 : vector<8x256xf32>
    %cst_5 = arith.constant 0.000000e+00 : f32
    %6 = vector.broadcast %cst_5 : f32 to vector<8x256xf32>
    %7 = arith.maximumf %5, %6 : vector<8x256xf32>
    %c0_6 = arith.constant 0 : index
    %c0_7 = arith.constant 0 : index
    %8 = vector.load %arg3[%c0_6, %c0_7] : memref<256x384xf32, #tpu.memory_space<vmem>>, vector<256x384xf32>
    %cst_8 = arith.constant dense<0.000000e+00> : vector<8x384xf32>
    %9 = tpu.matmul %7, %8, %cst_8 {dimension_numbers = #tpu.dot_dimension_numbers<[1], [0], [0], [1], [0, 0, 1, 1], [], []>} : vector<8x256xf32>, vector<256x384xf32>, vector<8x384xf32> -> vector<8x384xf32>
    %c0_9 = arith.constant 0 : index
    %c0_10 = arith.constant 0 : index
    %10 = vector.load %arg4[%c0_9, %c0_10] : memref<1x384xf32, #tpu.memory_space<vmem>>, vector<1x384xf32>
    %11 = vector.broadcast %10 : vector<1x384xf32> to vector<8x384xf32>
    %12 = arith.addf %9, %11 : vector<8x384xf32>
    %cst_11 = arith.constant 0.000000e+00 : f32
    %13 = vector.broadcast %cst_11 : f32 to vector<8x384xf32>
    %14 = arith.maximumf %12, %13 : vector<8x384xf32>
    %c0_12 = arith.constant 0 : index
    %c0_13 = arith.constant 0 : index
    %15 = vector.load %arg5[%c0_12, %c0_13] : memref<384x128xf32, #tpu.memory_space<vmem>>, vector<384x128xf32>
    %cst_14 = arith.constant dense<0.000000e+00> : vector<8x128xf32>
    %16 = tpu.matmul %14, %15, %cst_14 {dimension_numbers = #tpu.dot_dimension_numbers<[1], [0], [0], [1], [0, 0, 1, 1], [], []>} : vector<8x384xf32>, vector<384x128xf32>, vector<8x128xf32> -> vector<8x128xf32>
    %c0_15 = arith.constant 0 : index
    %c0_16 = arith.constant 0 : index
    %17 = vector.load %arg6[%c0_15, %c0_16] : memref<1x128xf32, #tpu.memory_space<vmem>>, vector<1x128xf32>
    %18 = vector.broadcast %17 : vector<1x128xf32> to vector<8x128xf32>
    %19 = arith.addf %16, %18 : vector<8x128xf32>
    %20 = tpu.iota {dimensions = array<i32: 1>} : vector<8x128xi32>
    %c6_i32 = arith.constant 6 : i32
    %21 = vector.broadcast %c6_i32 : i32 to vector<8x128xi32>
    %22 = arith.cmpi slt, %20, %21 : vector<8x128xi32>
    %23 = math.tanh %19 : vector<8x128xf32>
    %c12_i32 = arith.constant 12 : i32
    %24 = vector.broadcast %c12_i32 : i32 to vector<8x128xi32>
    %25 = arith.cmpi slt, %20, %24 : vector<8x128xi32>
    %cst_17 = arith.constant 2.000000e+01 : f32
    %26 = vector.broadcast %cst_17 : f32 to vector<8x128xf32>
    %27 = arith.cmpf ogt, %19, %26 : vector<8x128xf32>
    %28 = math.exp %19 : vector<8x128xf32>
    %29 = math.log1p %28 : vector<8x128xf32>
    %30 = arith.select %27, %19, %29 : vector<8x128xi1>, vector<8x128xf32>
    %31 = arith.select %25, %30, %19 : vector<8x128xi1>, vector<8x128xf32>
    %32 = arith.select %22, %23, %31 : vector<8x128xi1>, vector<8x128xf32>
    %c0_18 = arith.constant 0 : index
    %c0_19 = arith.constant 0 : index
    %33 = vector.load %arg7[%c0_18, %c0_19] : memref<8x128xf32, #tpu.memory_space<vmem>>, vector<8x128xf32>
    tpu.vector_store %arg7[%c0_18, %c0_19], %32 {strides = array<i32>} : memref<8x128xf32, #tpu.memory_space<vmem>>, vector<8x128xf32>,
    return
  }
}

</mosaic_0001>

<bundles_post_ra>
// kernel: tpu_custom_call.1
= control target key start
LH: loop header
LB: loop body
LE: loop exit
PB: predicated region body
PF: predicated region fallthrough
CT: control target
= control target key end

     0   :  { %12 = vsyncpa [#allocation3], 0  ;;  %s1036_s0 = inlined_call_operand.hbm [shape: f32[8,17], index: 0, kind: input, shape index: {}]   ;;  %s1037_s1 = inlined_call_operand.hbm [shape: f32[17,256], index: 1, kind: input, shape index: {}]   ;;  %s1038_s2 = inlined_call_operand.vmem [shape: f32[1,256], index: 2, kind: input, shape index: {}]   ;;  %s1039_s3 = inlined_call_operand.hbm [shape: f32[256,384], index: 3, kind: input, shape index: {}]   ;;  %s1040_s4 = inlined_call_operand.vmem [shape: f32[1,384], index: 4, kind: input, shape index: {}]   ;;  %s1041_s5 = inlined_call_operand.hbm [shape: f32[384,128], index: 5, kind: input, shape index: {}]   ;;  %s1042_s6 = inlined_call_operand.vmem [shape: f32[1,128], index: 6, kind: input, shape index: {}]   ;;  %s1043_s7 = inlined_call_operand.hbm [shape: f32[8,128], index: 7, kind: output, shape index: {}]  }
   0x1   :  { %13 = vsyncpa [#allocation6], 0 }
   0x2   :  { %14 = vsyncpa [#allocation9], 0 }
   0x3   :  { %15 = vsyncpa [#allocation4], 0  ;;  %s926_s24 = smov [#allocation5]  }
   0x4   :  { %s31_s25 = sshll.u32 %s926_s24, 4  ;;  %s32_s25 = int_to_ptr.vmem [resolvable:$true] %s31_s25 }
   0x5   :  { %s826_s26 = scalar_lea.vmem %s32_s25, 768  ;;  %p831_p1 = scmp.lt.s32.totalorder %s32_s25, %s32_s25 }
   0x6   :  { %p827_p0 = scmp.ne.s32.totalorder %s32_s25, %s826_s26  ;;  %p832_p2 = scmp.lt.s32.totalorder %s826_s26, %s826_s26 }
   0x8   :  { %p833_p3 = por %p832_p2, %p831_p1 }
   0xa   :  { %p834_p4 = pnand %p833_p3, %p827_p0 }
   0xc   :  { %837 = shalt.err (!%p834_p4)
}
   0xd   :  { %s927_s27 = smov 256   ;;  %s928_s28 = smov 16  }
   0xe   :  { %37 = dma.hbm_to_vmem [thread:$0]  %s1037_s1, 768, %s32_s25, [#allocation6], %s927_s27, %s927_s27, %s928_s28  }
   0xf   :  { %s929_s8 = smov [#allocation2]   ;;  %s930_s10 = smov [#allocation7]  }
  0x10   :  { %s22_s9 = sshll.u32 %s929_s8, 4  ;;  %s45_s11 = sshll.u32 %s930_s10, 4  ;;  %s23_s9 = int_to_ptr.vmem [resolvable:$true] %s22_s9  ;;  %s46_s11 = int_to_ptr.vmem [resolvable:$true] %s45_s11 }
  0x11   :  { %s846_s12 = scalar_lea.vmem %s23_s9, 128  ;;  %p851_p6 = scmp.lt.s32.totalorder %s23_s9, %s23_s9 }
  0x12   :  { %p847_p5 = scmp.ne.s32.totalorder %s23_s9, %s846_s12  ;;  %p852_p7 = scmp.lt.s32.totalorder %s846_s12, %s846_s12 }
  0x14   :  { %p853_p8 = por %p852_p7, %p851_p6 }
  0x16   :  { %p854_p9 = pnand %p853_p8, %p847_p5 }
  0x18   :  { %857 = shalt.err (!%p854_p9)
}
  0x19   :  { %25 = dma.hbm_to_vmem [thread:$0]  %s1036_s0, 128, %s23_s9, [#allocation3]  }
  0x1a   :  { %s866_s15 = scalar_lea.vmem %s46_s11, 12288  ;;  %p871_p11 = scmp.lt.s32.totalorder %s46_s11, %s46_s11 }
  0x1b   :  { %p867_p10 = scmp.ne.s32.totalorder %s46_s11, %s866_s15  ;;  %p872_p12 = scmp.lt.s32.totalorder %s866_s15, %s866_s15 }
  0x1d   :  { %p873_p13 = por %p872_p12, %p871_p11 }
  0x1f   :  { %p874_p0 = pnand %p873_p13, %p867_p10 }
  0x21   :  { %877 = shalt.err (!%p874_p0)
}
  0x22   :  { %s931_s1 = smov 384   ;;  %s932_s16 = smov 24  }
  0x23   :  { %51 = dma.hbm_to_vmem [thread:$0]  %s1039_s3, 12288, %s46_s11, [#allocation6], %s931_s1, %s931_s1, %s932_s16  }
  0x24   :  { %s933_s19 = smov [#allocation8]  }
  0x25   :  { %s59_s20 = sshll.u32 %s933_s19, 4  ;;  %s60_s20 = int_to_ptr.vmem [resolvable:$true] %s59_s20 }
  0x26   :  { %s886_s21 = scalar_lea.vmem %s60_s20, 6144  ;;  %p891_p2 = scmp.lt.s32.totalorder %s60_s20, %s60_s20 }
  0x27   :  { %p887_p1 = scmp.ne.s32.totalorder %s60_s20, %s886_s21  ;;  %p892_p3 = scmp.lt.s32.totalorder %s886_s21, %s886_s21 }
  0x29   :  { %p893_p4 = por %p892_p3, %p891_p2 }
  0x2b   :  { %p894_p5 = pnand %p893_p4, %p887_p1 }
  0x2d   :  { %897 = shalt.err (!%p894_p5)
}
  0x2e   :  { %s934_s0 = smov 128   ;;  %s935_s22 = smov 8  }
  0x2f   :  { %65 = dma.hbm_to_vmem [thread:$0]  %s1041_s5, 6144, %s60_s20, [#allocation9], %s934_s0, %s934_s0, %s935_s22  }
  0x30   :  { %918 = dma.done.wait [#allocation3], 128  }
  0x31   :  { %919 = vsyncadd [#allocation3], 4294967168 }
  0x32   :  { %920 = dma.done.wait [#allocation6], 13056  }
  0x33   :  { %921 = vsyncadd [#allocation6], 4294954240 }
  0x34   :  { %922 = dma.done.wait [#allocation9], 6144  }
  0x35   :  { %923 = vsyncadd [#allocation9], 4294961152  ;;  %v936_v0 = vmov 0.0   ;;  %vm103_vm0 = vcmask 1040384   ;;  %v86_v1 = vld [vmem:[#allocation5 + $0x28] sm:$0x1] }
  0x36   :  { %174 = vmatprep.mubr.f32.mxu0 %v936_v0  ;;  %v85_v2 = vld [vmem:[#allocation5 + $0x20] sm:$0x1]  ;;  %v84_v3 = vld [vmem:[#allocation5 + $0x18] sm:$0xff]  ;;  %673 = vmatprep.subr.msk.mxu0 %vm103_vm0, %v86_v1  ;;  %v83_v4 = vld [vmem:[#allocation5 + $0x10] sm:$0xff]  ;;  %vm99_vm1 = vcmask 138240   ;;  %vm937_vm2 = vmmov 0  }
  0x37   :  { %674 = vmatpush1.msk.msra.mxu0 %vm103_vm0, %v85_v2  ;;  %v82_v5 = vld [vmem:[#allocation5 + $0x8] sm:$0xff]  ;;  %v229_v6 = vld [vmem:[#allocation7 + $0x170] sm:$0xff]  ;;  %v228_v7 = vld [vmem:[#allocation7 + $0x168] sm:$0xff] }
  0x38   :  { %138 = vmatprep.subr.mxu0 %v84_v3  ;;  %v81_v8 = vld [vmem:[#allocation5] sm:$0xff]  ;;  %296 = vmatprep.subr.mxu1 %v229_v6  ;;  %v226_v9 = vld [vmem:[#allocation7 + $0x158] sm:$0xff]  ;;  %v80_v11 = vld [vmem:[#allocation2] sm:$0xff] }
  0x39   :  { %v225_v10 = vld [vmem:[#allocation7 + $0x150] sm:$0xff]  ;;  %139 = vmatpush1.msra.mxu0 %v83_v4  ;;  %297 = vmatpush1.msra.mxu1 %v228_v7  ;;  %v223_v12 = vld [vmem:[#allocation7 + $0x140] sm:$0xff]  ;;  %v222_v13 = vld [vmem:[#allocation7 + $0x138] sm:$0xff] }
  0x3a   :  { %140 = vmatprep.subr.mxu0 %v82_v5  ;;  %298 = vmatprep.subr.mxu1 %v226_v9  ;;  %v220_v14 = vld [vmem:[#allocation7 + $0x128] sm:$0xff]  ;;  %v219_v15 = vld [vmem:[#allocation7 + $0x120] sm:$0xff]  ;;  %v217_v16 = vld [vmem:[#allocation7 + $0x110] sm:$0xff] }
  0x3b   :  { %141 = vmatpush1.msra.mxu0 %v81_v8  ;;  %299 = vmatpush1.msra.mxu1 %v225_v10  ;;  %v216_v17 = vld [vmem:[#allocation7 + $0x108] sm:$0xff]  ;;  %v214_v18 = vld [vmem:[#allocation7 + $0xf8] sm:$0xff]  ;;  %v213_v19 = vld [vmem:[#allocation7 + $0xf0] sm:$0xff] }
  0x3c   :  { %675 = vmatmul.mubr.msk.f32.vlgmr.msra.gmra.mxu0 %vm99_vm1, %v80_v11  ;;  %300 = vmatprep.subr.mxu1 %v223_v12  ;;  %v211_v20 = vld [vmem:[#allocation7 + $0xe0] sm:$0xff]  ;;  %v210_v21 = vld [vmem:[#allocation7 + $0xd8] sm:$0xff]  ;;  %v208_v23 = vld [vmem:[#allocation7 + $0xc8] sm:$0xff] }
  0x3d   :  { %301 = vmatpush1.msra.mxu1 %v222_v13  ;;  %v278_v22 = vld [vmem:[#allocation7 + $0x2f8] sm:$0xff]  ;;  %v275_v25 = vld [vmem:[#allocation7 + $0x2e0] sm:$0xff]  ;;  %v205_v28 = vld [vmem:[#allocation7 + $0xb0] sm:$0xff] }
  0x3e   :  { %302 = vmatprep.subr.mxu1 %v220_v14  ;;  %677 = vmatprep.subr.mxu0 %v278_v22  ;;  %v230_v24 = vld [vmem:[#allocation7 + $0x178] sm:$0xff]  ;;  %v207_v26 = vld [vmem:[#allocation7 + $0xc0] sm:$0xff]  ;;  %v272_v29 = vld [vmem:[#allocation7 + $0x2c8] sm:$0xff] }
  0x3f   :  { %303 = vmatpush1.msra.mxu1 %v219_v15  ;;  %678 = vmatpush3.msra.mxu0 %v230_v24  ;;  %v227_v27 = vld [vmem:[#allocation7 + $0x160] sm:$0xff]  ;;  %v224_v30 = vld [vmem:[#allocation7 + $0x148] sm:$0xff]  ;;  %v269_v32 = vld [vmem:[#allocation7 + $0x2b0] sm:$0xff] }
  0x40   :  { %304 = vmatprep.subr.mxu1 %v217_v16  ;;  %679 = vmatprep.subr.mxu0 %v275_v25  ;;  %v204_v31 = vld [vmem:[#allocation7 + $0xa8] sm:$0xff]  ;;  %v202_v33 = vld [vmem:[#allocation7 + $0x98] sm:$0xff]  ;;  %v221_v34 = vld [vmem:[#allocation7 + $0x130] sm:$0xff] }
  0x41   :  { %305 = vmatpush1.msra.mxu1 %v216_v17  ;;  %680 = vmatpush3.msra.mxu0 %v227_v27  ;;  %v201_v35 = vld [vmem:[#allocation7 + $0x90] sm:$0xff]  ;;  %v266_v36 = vld [vmem:[#allocation7 + $0x298] sm:$0xff]  ;;  %v199_v37 = vld [vmem:[#allocation7 + $0x80] sm:$0xff] }
  0x42   :  { %306 = vmatprep.subr.mxu1 %v214_v18  ;;  %681 = vmatprep.subr.mxu0 %v272_v29  ;;  %v218_v38 = vld [vmem:[#allocation7 + $0x118] sm:$0xff]  ;;  %v263_v40 = vld [vmem:[#allocation7 + $0x280] sm:$0xff]  ;;  %v196_v41 = vld [vmem:[#allocation7 + $0x68] sm:$0xff] }
  0x43   :  { %307 = vmatpush1.msra.mxu1 %v213_v19  ;;  %682 = vmatpush3.msra.mxu0 %v224_v30  ;;  %v198_v39 = vld [vmem:[#allocation7 + $0x78] sm:$0xff]  ;;  %v215_v42 = vld [vmem:[#allocation7 + $0x100] sm:$0xff]  ;;  %v260_v44 = vld [vmem:[#allocation7 + $0x268] sm:$0xff] }
  0x44   :  { %308 = vmatprep.subr.mxu1 %v211_v20  ;;  %683 = vmatprep.subr.mxu0 %v269_v32  ;;  %v195_v43 = vld [vmem:[#allocation7 + $0x60] sm:$0xff]  ;;  %v193_v45 = vld [vmem:[#allocation7 + $0x50] sm:$0xff]  ;;  %v212_v46 = vld [vmem:[#allocation7 + $0xe8] sm:$0xff] }
  0x45   :  { %309 = vmatpush1.msra.mxu1 %v210_v21  ;;  %684 = vmatpush3.msra.mxu0 %v221_v34  ;;  %v192_v47 = vld [vmem:[#allocation7 + $0x48] sm:$0xff]  ;;  %v257_v48 = vld [vmem:[#allocation7 + $0x250] sm:$0xff]  ;;  %v190_v49 = vld [vmem:[#allocation7 + $0x38] sm:$0xff] }
  0x46   :  { %310 = vmatprep.subr.mxu1 %v208_v23  ;;  %685 = vmatprep.subr.mxu0 %v266_v36  ;;  %v209_v50 = vld [vmem:[#allocation7 + $0xd0] sm:$0xff]  ;;  %v254_v52 = vld [vmem:[#allocation7 + $0x238] sm:$0xff]  ;;  %v187_v53 = vld [vmem:[#allocation7 + $0x20] sm:$0xff] }
  0x47   :  { %311 = vmatpush1.msra.mxu1 %v207_v26  ;;  %686 = vmatpush3.msra.mxu0 %v218_v38  ;;  %v189_v51 = vld [vmem:[#allocation7 + $0x30] sm:$0xff]  ;;  %v206_v54 = vld [vmem:[#allocation7 + $0xb8] sm:$0xff]  ;;  %v251_v56 = vld [vmem:[#allocation7 + $0x220] sm:$0xff] }
  0x48   :  { %312 = vmatprep.subr.mxu1 %v205_v28  ;;  %687 = vmatprep.subr.mxu0 %v263_v40  ;;  %v186_v55 = vld [vmem:[#allocation7 + $0x18] sm:$0xff]  ;;  %v184_v57 = vld [vmem:[#allocation7 + $0x8] sm:$0xff]  ;;  %v203_v58 = vld [vmem:[#allocation7 + $0xa0] sm:$0xff] }
  0x49   :  { %313 = vmatpush1.msra.mxu1 %v204_v31  ;;  %688 = vmatpush3.msra.mxu0 %v215_v42  ;;  %v183_v59 = vld [vmem:[#allocation7] sm:$0xff]  ;;  %v248_v60 = vld [vmem:[#allocation7 + $0x208] sm:$0xff]  ;;  %v277_v61 = vld [vmem:[#allocation7 + $0x2f0] sm:$0xff]  ;;  %v89_v42 = vlaneseq }
  0x4a   :  { %314 = vmatprep.subr.mxu1 %v202_v33  ;;  %689 = vmatprep.subr.mxu0 %v260_v44  ;;  %v200_v62 = vld [vmem:[#allocation7 + $0x88] sm:$0xff]  ;;  %v245_v1 = vld [vmem:[#allocation7 + $0x1f0] sm:$0xff]  ;;  %v274_v2 = vld [vmem:[#allocation7 + $0x2d8] sm:$0xff] }
  0x4b   :  { %315 = vmatpush1.msra.mxu1 %v201_v35  ;;  %690 = vmatpush3.msra.mxu0 %v212_v46  ;;  %v276_v63 = vld [vmem:[#allocation7 + $0x2e8] sm:$0xff]  ;;  %v197_v3 = vld [vmem:[#allocation7 + $0x70] sm:$0xff]  ;;  %v271_v5 = vld [vmem:[#allocation7 + $0x2c0] sm:$0xff] }
  0x4c   :  { %316 = vmatprep.subr.mxu1 %v199_v37  ;;  %691 = vmatprep.subr.mxu0 %v257_v48  ;;  %v273_v4 = vld [vmem:[#allocation7 + $0x2d0] sm:$0xff]  ;;  %v270_v6 = vld [vmem:[#allocation7 + $0x2b8] sm:$0xff]  ;;  %v268_v7 = vld [vmem:[#allocation7 + $0x2a8] sm:$0xff] }
  0x4d   :  { %317 = vmatpush1.msra.mxu1 %v198_v39  ;;  %692 = vmatpush3.msra.mxu0 %v209_v50  ;;  %v267_v8 = vld [vmem:[#allocation7 + $0x2a0] sm:$0xff]  ;;  %v265_v9 = vld [vmem:[#allocation7 + $0x290] sm:$0xff]  ;;  %v264_v10 = vld [vmem:[#allocation7 + $0x288] sm:$0xff] }
  0x4e   :  { %318 = vmatprep.subr.mxu1 %v196_v41  ;;  %693 = vmatprep.subr.mxu0 %v254_v52  ;;  %v262_v11 = vld [vmem:[#allocation7 + $0x278] sm:$0xff]  ;;  %v261_v12 = vld [vmem:[#allocation7 + $0x270] sm:$0xff]  ;;  %v259_v13 = vld [vmem:[#allocation7 + $0x260] sm:$0xff] }
  0x4f   :  { %319 = vmatpush1.msra.mxu1 %v195_v43  ;;  %694 = vmatpush3.msra.mxu0 %v206_v54  ;;  %v258_v14 = vld [vmem:[#allocation7 + $0x258] sm:$0xff]  ;;  %v256_v15 = vld [vmem:[#allocation7 + $0x248] sm:$0xff]  ;;  %v255_v16 = vld [vmem:[#allocation7 + $0x240] sm:$0xff]  ;;  %v994_v43 = vshrl.u32 %v89_v42, 7 }
  0x50   :  { %320 = vmatprep.subr.mxu1 %v193_v45  ;;  %695 = vmatprep.subr.mxu0 %v251_v56  ;;  %v253_v17 = vld [vmem:[#allocation7 + $0x230] sm:$0xff]  ;;  %v252_v18 = vld [vmem:[#allocation7 + $0x228] sm:$0xff]  ;;  %v250_v19 = vld [vmem:[#allocation7 + $0x218] sm:$0xff] }
  0x51   :  { %321 = vmatpush1.msra.mxu1 %v192_v47  ;;  %696 = vmatpush3.msra.mxu0 %v203_v58  ;;  %v249_v20 = vld [vmem:[#allocation7 + $0x210] sm:$0xff]  ;;  %v247_v21 = vld [vmem:[#allocation7 + $0x200] sm:$0xff]  ;;  %v246_v22 = vld [vmem:[#allocation7 + $0x1f8] sm:$0xff]  ;;  %v91_v44 = vsub.s32 0, %v994_v43  ;;  %v95_v46 = vsub.s32 1, %v994_v43 }
  0x52   :  { %322 = vmatprep.subr.mxu1 %v190_v49  ;;  %697 = vmatprep.subr.mxu0 %v248_v60  ;;  %v244_v23 = vld [vmem:[#allocation7 + $0x1e8] sm:$0xff]  ;;  %v243_v24 = vld [vmem:[#allocation7 + $0x1e0] sm:$0xff]  ;;  %v241_v25 = vld [vmem:[#allocation7 + $0x1d0] sm:$0xff] }
  0x53   :  { %323 = vmatpush1.msra.mxu1 %v189_v51  ;;  %698 = vmatpush3.msra.mxu0 %v200_v62  ;;  %v242_v26 = vld [vmem:[#allocation7 + $0x1d8] sm:$0xff]  ;;  %v240_v27 = vld [vmem:[#allocation7 + $0x1c8] sm:$0xff]  ;;  %v239_v30 = vld [vmem:[#allocation7 + $0x1c0] sm:$0xff] }
  0x54   :  { %324 = vmatprep.subr.mxu1 %v187_v53  ;;  %699 = vmatprep.subr.mxu0 %v245_v1  ;;  %v194_v28 = vld [vmem:[#allocation7 + $0x58] sm:$0xff]  ;;  %v237_v31 = vld [vmem:[#allocation7 + $0x1b0] sm:$0xff]  ;;  %v191_v32 = vld [vmem:[#allocation7 + $0x40] sm:$0xff] }
  0x55   :  { %325 = vmatpush1.msra.mxu1 %v186_v55  ;;  %700 = vmatpush3.msra.mxu0 %v197_v3  ;;  %v238_v29 = vld [vmem:[#allocation7 + $0x1b8] sm:$0xff]  ;;  %v235_v33 = vld [vmem:[#allocation7 + $0x1a0] sm:$0xff]  ;;  %v236_v34 = vld [vmem:[#allocation7 + $0x1a8] sm:$0xff] }
  0x56   :  { %326 = vmatprep.subr.mxu1 %v184_v57  ;;  %701 = vmatprep.subr.mxu0 %v242_v26  ;;  %v234_v35 = vld [vmem:[#allocation7 + $0x198] sm:$0xff]  ;;  %v188_v36 = vld [vmem:[#allocation7 + $0x28] sm:$0xff]  ;;  %v233_v38 = vld [vmem:[#allocation7 + $0x190] sm:$0xff] }
  0x57   :  { %327 = vmatpush1.msra.mxu1 %v183_v59  ;;  %702 = vmatpush3.msra.mxu0 %v194_v28  ;;  %v232_v37 = vld [vmem:[#allocation7 + $0x188] sm:$0xff]  ;;  %v231_v39 = vld [vmem:[#allocation7 + $0x180] sm:$0xff]  ;;  %v185_v40 = vld [vmem:[#allocation7 + $0x10] sm:$0xff] }
  0x58   :  { %328 = vmatprep.subr.mxu1 %v277_v61  ;;  %703 = vmatprep.subr.mxu0 %v239_v30  ;;  %v471_v41 = vld [vmem:[#allocation8 + $0xf8] sm:$0xff]  ;;  %v87_v45 = vld [vmem:[%s1038_s2] sm:$0x3]  ;;  %v470_v57 = vld [vmem:[#allocation8 + $0xf0] sm:$0xff] }
  0x59   :  { %329 = vmatpush2.msra.mxu1 %v276_v63  ;;  %704 = vmatpush3.msra.mxu0 %v191_v32  ;;  %v92_v47 = vrot.slane %v87_v45, %v91_v44  ;;  %v96_v48 = vrot.slane %v87_v45, %v95_v46  ;;  %v455_v55 = vld [vmem:[#allocation8 + $0x78] sm:$0xff]  ;;  %v454_v58 = vld [vmem:[#allocation8 + $0x70] sm:$0xff]  ;;  %v469_v60 = vld [vmem:[#allocation8 + $0xe8] sm:$0xff] }
  0x5a   :  { %330 = vmatprep.subr.mxu1 %v274_v2  ;;  %705 = vmatprep.subr.mxu0 %v236_v34  ;;  %v487_v56 = vld [vmem:[#allocation8 + $0x178] sm:$0xff]  ;;  %v486_v59 = vld [vmem:[#allocation8 + $0x170] sm:$0xff]  ;;  %v453_v61 = vld [vmem:[#allocation8 + $0x68] sm:$0xff] }
  0x5b   :  { %331 = vmatpush2.msra.mxu1 %v273_v4  ;;  %706 = vmatpush3.msra.mxu0 %v188_v36  ;;  %v485_v62 = vld [vmem:[#allocation8 + $0x168] sm:$0xff]  ;;  %v468_v63 = vld [vmem:[#allocation8 + $0xe0] sm:$0xff]  ;;  %v467_v3 = vld [vmem:[#allocation8 + $0xd8] sm:$0xff] }
  0x5c   :  { %332 = vmatprep.subr.mxu1 %v271_v5  ;;  %707 = vmatprep.subr.mxu0 %v233_v38  ;;  %v452_v1 = vld [vmem:[#allocation8 + $0x60] sm:$0xff]  ;;  %v451_v4 = vld [vmem:[#allocation8 + $0x58] sm:$0xff]  ;;  %v457_v32 = vld [vmem:[#allocation8 + $0x88] sm:$0xff] }
  0x5d   :  { %333 = vmatpush2.msra.mxu1 %v270_v6  ;;  %708 = vmatpush3.msra.mxu0 %v185_v40  ;;  %v484_v2 = vld [vmem:[#allocation8 + $0x160] sm:$0xff]  ;;  %v483_v5 = vld [vmem:[#allocation8 + $0x158] sm:$0xff]  ;;  %v466_v6 = vld [vmem:[#allocation8 + $0xd0] sm:$0xff]  ;;  %v291_v40 = vsub.s32 2, %v994_v43 }
  0x5e   :  { %334 = vmatprep.subr.mxu1 %v268_v7  ;;  %712 = vmatprep.subr.mxu0 %v471_v41  ;;  %v450_v7 = vld [vmem:[#allocation8 + $0x50] sm:$0xff]  ;;  %v459_v26 = vld [vmem:[#allocation8 + $0x98] sm:$0xff]  ;;  %v441_v34 = vld [vmem:[#allocation8 + $0x8] sm:$0xff] }
  0x5f   :  { %335 = vmatpush2.msra.mxu1 %v267_v8  ;;  %v482_v8 = vld [vmem:[#allocation8 + $0x150] sm:$0xff]  ;;  %v443_v28 = vld [vmem:[#allocation8 + $0x18] sm:$0xff]  ;;  %v473_v36 = vld [vmem:[#allocation8 + $0x108] sm:$0xff] }
  0x60   :  { %336 = vmatprep.subr.mxu1 %v265_v9  ;;  %v465_v9 = vld [vmem:[#allocation8 + $0xc8] sm:$0xff]  ;;  %v475_v30 = vld [vmem:[#allocation8 + $0x118] sm:$0xff]  ;;  %v472_v38 = vld [vmem:[#allocation8 + $0x100] sm:$0xff] }
  0x61   :  { %337 = vmatpush2.msra.mxu1 %v264_v10  ;;  %v449_v10 = vld [vmem:[#allocation8 + $0x48] sm:$0xff] }
  0x62   :  { %338 = vmatprep.subr.mxu1 %v262_v11  ;;  %v481_v11 = vld [vmem:[#allocation8 + $0x148] sm:$0xff] }
  0x63   :  { %339 = vmatpush2.msra.mxu1 %v261_v12  ;;  %v464_v12 = vld [vmem:[#allocation8 + $0xc0] sm:$0xff]  ;;  %v676_v43 = vld [vmem:[%s1042_s6] ss:$0 sm:$0xff]  ;;  %s938_s6 = smov [#allocation10]  }
  0x64   :  { %340 = vmatprep.subr.mxu1 %v259_v13  ;;  %v448_v13 = vld [vmem:[#allocation8 + $0x40] sm:$0xff]  ;;  %s662_s27 = sshll.u32 %s938_s6, 4  ;;  %s663_s27 = int_to_ptr.vmem [resolvable:$true] %s662_s27 }
  0x65   :  { %341 = vmatpush2.msra.mxu1 %v258_v14  ;;  %v480_v14 = vld [vmem:[#allocation8 + $0x140] sm:$0xff]  ;;  %s898_s28 = scalar_lea.vmem %s663_s27, 128  ;;  %p903_p7 = scmp.lt.s32.totalorder %s663_s27, %s663_s27 }
  0x66   :  { %342 = vmatprep.subr.mxu1 %v256_v15  ;;  %v463_v15 = vld [vmem:[#allocation8 + $0xb8] sm:$0xff]  ;;  %p899_p6 = scmp.ne.s32.totalorder %s663_s27, %s898_s28  ;;  %p904_p8 = scmp.lt.s32.totalorder %s898_s28, %s898_s28 }
  0x67   :  { %343 = vmatpush2.msra.mxu1 %v255_v16  ;;  %v447_v16 = vld [vmem:[#allocation8 + $0x38] sm:$0xff] }
  0x68   :  { %344 = vmatprep.subr.mxu1 %v253_v17  ;;  %v479_v17 = vld [vmem:[#allocation8 + $0x138] sm:$0xff]  ;;  %p905_p9 = por %p904_p8, %p903_p7 }
  0x69   :  { %345 = vmatpush2.msra.mxu1 %v252_v18  ;;  %v462_v18 = vld [vmem:[#allocation8 + $0xb0] sm:$0xff] }
  0x6a   :  { %346 = vmatprep.subr.mxu1 %v250_v19  ;;  %v446_v19 = vld [vmem:[#allocation8 + $0x30] sm:$0xff]  ;;  %p906_p10 = pnand %p905_p9, %p899_p6 }
  0x6b   :  { %347 = vmatpush2.msra.mxu1 %v249_v20  ;;  %v478_v20 = vld [vmem:[#allocation8 + $0x130] sm:$0xff] }
  0x6c   :  { %348 = vmatprep.subr.mxu1 %v247_v21  ;;  %v461_v21 = vld [vmem:[#allocation8 + $0xa8] sm:$0xff] }
  0x6d   :  { %349 = vmatpush2.msra.mxu1 %v246_v22  ;;  %v445_v22 = vld [vmem:[#allocation8 + $0x28] sm:$0xff] }
  0x6e   :  { %350 = vmatprep.subr.mxu1 %v244_v23  ;;  %v477_v23 = vld [vmem:[#allocation8 + $0x128] sm:$0xff] }
  0x6f   :  { %351 = vmatpush2.msra.mxu1 %v243_v24  ;;  %v460_v24 = vld [vmem:[#allocation8 + $0xa0] sm:$0xff] }
  0x70   :  { %352 = vmatprep.subr.mxu1 %v241_v25  ;;  %v444_v25 = vld [vmem:[#allocation8 + $0x20] sm:$0xff] }
  0x71   :  { %353 = vmatpush2.msra.mxu1 %v240_v27  ;;  %v476_v27 = vld [vmem:[#allocation8 + $0x120] sm:$0xff] }
  0x72   :  { %354 = vmatprep.subr.mxu1 %v238_v29  ;;  %v458_v29 = vld [vmem:[#allocation8 + $0x90] sm:$0xff] }
  0x73   :  { %355 = vmatpush2.msra.mxu1 %v237_v31  ;;  %v442_v31 = vld [vmem:[#allocation8 + $0x10] sm:$0xff] }
  0x74   :  { %356 = vmatprep.subr.mxu1 %v235_v33  ;;  %v474_v33 = vld [vmem:[#allocation8 + $0x110] sm:$0xff] }
  0x75   :  { %357 = vmatpush2.msra.mxu1 %v234_v35  ;;  %v456_v35 = vld [vmem:[#allocation8 + $0x80] sm:$0xff] }
  0x76   :  { %358 = vmatprep.subr.mxu1 %v232_v37  ;;  %v440_v37 = vld [vmem:[#allocation8] sm:$0xff] }
  0x77   :  { %359 = vmatpush2.msra.mxu1 %v231_v39  ;;  %v279_v39 = vld [vmem:[%s1040_s4] sm:$0x7] }
  0x78   :  { %764 = vmatprep.subr.mxu1 %v936_v0  ;;  %v284_v41 = vrot.slane %v279_v39, %v91_v44  ;;  %v288_v45 = vrot.slane %v279_v39, %v95_v46 }
  0xfc   :  { %v176_v49 = vpop.f32.mrf.mxu0 }
  0xfd   :  { %v177_v50 = vadd.f32 %v176_v49, %v92_v47  ;;  %v292_v49 = vrot.slane %v279_v39, %v291_v40 }
  0xfe   :  { %v178_v51 = vpop.f32.mrf.mxu0 }
  0xff   :  { %v179_v52 = vadd.f32 %v178_v51, %v96_v48  ;;  %v181_v54 = vmax.f32 %v177_v50, 0.0 }
 0x101   :  { %v182_v53 = vmax.f32 %v179_v52, 0.0 }
 0x103   :  { %360 = vmatprep.mubr.f32.mxu1 %v182_v53  ;;  %431 = vmatprep.mubr.f32.mxu0 %v182_v53 }
 0x104   :  { %361 = vmatmul.mubr.f32.vlgmr.msra.gmra.mxu1 %v181_v54  ;;  %432 = vmatmul.mubr.f32.vlgmr.msra.gmra.mxu0 %v181_v54 }
 0x105   :  { %713 = vmatpush3.msra.mxu0 %v455_v55  ;;  %765 = vmatpush3.msra.mxu1 %v487_v56 }
 0x106   :  { %714 = vmatprep.subr.mxu0 %v470_v57  ;;  %766 = vmatprep.subr.mxu1 %v936_v0 }
 0x107   :  { %715 = vmatpush3.msra.mxu0 %v454_v58  ;;  %767 = vmatpush3.msra.mxu1 %v486_v59 }
 0x108   :  { %716 = vmatprep.subr.mxu0 %v469_v60  ;;  %768 = vmatprep.subr.mxu1 %v936_v0 }
 0x109   :  { %717 = vmatpush3.msra.mxu0 %v453_v61  ;;  %769 = vmatpush3.msra.mxu1 %v485_v62 }
 0x10a   :  { %718 = vmatprep.subr.mxu0 %v468_v63  ;;  %770 = vmatprep.subr.mxu1 %v936_v0 }
 0x10b   :  { %719 = vmatpush3.msra.mxu0 %v452_v1  ;;  %771 = vmatpush3.msra.mxu1 %v484_v2 }
 0x10c   :  { %720 = vmatprep.subr.mxu0 %v467_v3  ;;  %772 = vmatprep.subr.mxu1 %v936_v0 }
 0x10d   :  { %721 = vmatpush3.msra.mxu0 %v451_v4  ;;  %773 = vmatpush3.msra.mxu1 %v483_v5  ;;  %v636_v5 = vand.u32 127, %v89_v42 }
 0x10e   :  { %722 = vmatprep.subr.mxu0 %v466_v6  ;;  %774 = vmatprep.subr.mxu1 %v936_v0 }
 0x10f   :  { %723 = vmatpush3.msra.mxu0 %v450_v7  ;;  %775 = vmatpush3.msra.mxu1 %v482_v8  ;;  %vm639_vm3 = vcmp.lt.s32.totalorder %v636_v5, 12  ;;  %vm637_vm5 = vcmp.lt.s32.totalorder %v636_v5, 6 }
 0x110   :  { %724 = vmatprep.subr.mxu0 %v465_v9  ;;  %776 = vmatprep.subr.mxu1 %v936_v0 }
 0x111   :  { %725 = vmatpush3.msra.mxu0 %v449_v10  ;;  %777 = vmatpush3.msra.mxu1 %v481_v11 }
 0x112   :  { %726 = vmatprep.subr.mxu0 %v464_v12  ;;  %778 = vmatprep.subr.mxu1 %v936_v0 }
 0x113   :  { %727 = vmatpush3.msra.mxu0 %v448_v13  ;;  %779 = vmatpush3.msra.mxu1 %v480_v14 }
 0x114   :  { %728 = vmatprep.subr.mxu0 %v463_v15  ;;  %780 = vmatprep.subr.mxu1 %v936_v0 }
 0x115   :  { %729 = vmatpush3.msra.mxu0 %v447_v16  ;;  %781 = vmatpush3.msra.mxu1 %v479_v17 }
 0x116   :  { %730 = vmatprep.subr.mxu0 %v462_v18  ;;  %782 = vmatprep.subr.mxu1 %v936_v0 }
 0x117   :  { %731 = vmatpush3.msra.mxu0 %v446_v19  ;;  %783 = vmatpush3.msra.mxu1 %v478_v20 }
 0x118   :  { %732 = vmatprep.subr.mxu0 %v461_v21  ;;  %784 = vmatprep.subr.mxu1 %v936_v0 }
 0x119   :  { %733 = vmatpush3.msra.mxu0 %v445_v22  ;;  %785 = vmatpush3.msra.mxu1 %v477_v23 }
 0x11a   :  { %734 = vmatprep.subr.mxu0 %v460_v24  ;;  %786 = vmatprep.subr.mxu1 %v936_v0 }
 0x11b   :  { %735 = vmatpush3.msra.mxu0 %v444_v25  ;;  %787 = vmatpush3.msra.mxu1 %v476_v27 }
 0x11c   :  { %736 = vmatprep.subr.mxu0 %v459_v26  ;;  %788 = vmatprep.subr.mxu1 %v936_v0 }
 0x11d   :  { %737 = vmatpush3.msra.mxu0 %v443_v28  ;;  %789 = vmatpush3.msra.mxu1 %v475_v30 }
 0x11e   :  { %738 = vmatprep.subr.mxu0 %v458_v29  ;;  %790 = vmatprep.subr.mxu1 %v936_v0 }
 0x11f   :  { %739 = vmatpush3.msra.mxu0 %v442_v31  ;;  %791 = vmatpush3.msra.mxu1 %v474_v33 }
 0x120   :  { %740 = vmatprep.subr.mxu0 %v457_v32  ;;  %792 = vmatprep.subr.mxu1 %v936_v0 }
 0x121   :  { %741 = vmatpush3.msra.mxu0 %v441_v34  ;;  %793 = vmatpush3.msra.mxu1 %v473_v36 }
 0x122   :  { %742 = vmatprep.subr.mxu0 %v456_v35  ;;  %794 = vmatprep.subr.mxu1 %v936_v0 }
 0x123   :  { %743 = vmatpush3.msra.mxu0 %v440_v37  ;;  %795 = vmatpush3.msra.mxu1 %v472_v38 }
 0x124   :  { %796 = vmatprep.mubr.msk.f32.mxu1 %vm937_vm2, %v936_v0 }
 0x1c4   :  { %v362_v47 = vpop.f32.mrf.mxu1  ;;  %v709_v48 = vpop.f32.mrf.mxu0 }
 0x1c5   :  { %v363_v50 = vadd.f32 %v362_v47, %v284_v41 }
 0x1c6   :  { %v364_v51 = vpop.f32.mrf.mxu1  ;;  %v710_v52 = vpop.f32.mrf.mxu0 }
 0x1c7   :  { %v365_v53 = vadd.f32 %v364_v51, %v288_v45  ;;  %v711_v0 = vadd.f32 %v710_v52, %v709_v48  ;;  %v437_v56 = vmax.f32 %v363_v50, 0.0 }
 0x1c9   :  { %v438_v54 = vmax.f32 %v365_v53, 0.0  ;;  %v434_v55 = vadd.f32 %v711_v0, %v292_v49 }
 0x1cb   :  { %v439_v57 = vmax.f32 %v434_v55, 0.0  ;;  %559 = vmatprep.mubr.f32.mxu0 %v438_v54 }
 0x1cc   :  { %560 = vmatmul.mubr.f32.vlgmr.msra.gmra.mxu0 %v437_v56 }
 0x1cd   :  { %797 = vmatmul.mubr.f32.vlgmr.msra.gmra.mxu1 %v439_v57 }
 0x28c   :  { %v744_v58 = vpop.f32.mrf.mxu0 }
 0x28d   :  { %v631_v44 = vpop.f32.mrf.mxu1 }
 0x28e   :  { %v745_v46 = vpop.f32.mrf.mxu0 }
 0x28f   :  { %v746_v59 = vadd.f32 %v745_v46, %v744_v58  ;;  %v798_v60 = vpop.f32.mrf.mxu1 }
 0x291   :  { %v562_v61 = vadd.f32 %v746_v59, %v676_v43 }
 0x293   :  { %v632_v62 = vadd.f32 %v631_v44, %v562_v61 }
 0x295   :  { %v641_v63 = vmul.f32 1.442695, %v632_v62  ;;  %vm640_vm6 = vcmp.gt.f32.partialorder %v632_v62, 20.0 }
 0x297   :  { %812 = vpow2.f32 %v641_v63 }
 0x2a4   :  { %v813_v1 = vpop.eup %812 }
 0x2a5   :  { %v643_v2 = vadd.f32 1.0, %v813_v1  ;;  %v646_v3 = vmul.f32 -0.5, %v813_v1  ;;  %v649_v6 = vand.u32 2147483647, %v813_v1 }
 0x2a7   :  { %814 = vlog2.f32 %v643_v2  ;;  %v647_v4 = vadd.f32 1.0, %v646_v3  ;;  %vm650_vm4 = vcmp.lt.f32.partialorder %v649_v6, 0.0004427343 }
 0x2a8   :  { %816 = vtanh.f32 %v632_v62 }
 0x2a9   :  { %v648_v9 = vmul.f32 %v813_v1, %v647_v4 }
 0x2b4   :  { %v815_v7 = vpop.eup %814 }
 0x2b5   :  { %v645_v8 = vmul.f32 0.6931472, %v815_v7  ;;  %v817_v12 = vpop.eup %816 }
 0x2b7   :  { %v651_v10 = vsel %vm650_vm4, %v648_v9, %v645_v8 }
 0x2b8   :  { %v652_v11 = vsel %vm640_vm6, %v632_v62, %v651_v10 }
 0x2b9   :  { %v653_v13 = vsel %vm639_vm3, %v652_v11, %v632_v62 }
 0x2ba   :  { %v654_v14 = vsel %vm637_vm5, %v817_v12, %v653_v13 }
 0x2bb   :  { %655 = vst [vmem:[#allocation10] sm:$0xff] %v654_v14 }
 0x2bc   :  { %909 = shalt.err (!%p906_p10)
}
 0x2bd   :  { %665 = dma.vmem_to_hbm [thread:$0]  %s663_s27, 128, %s1043_s7, [#allocation4]  }
 0x2be   :  { %924 = dma.done.wait [#allocation4], 128  }
 0x2bf   :  { %925 = vsyncadd [#allocation4], 4294967168 }
 0x2c0   :  { %669 = vsyncpa [#allocation3], 1 }
 0x2c1   :  { %670 = vsyncpa [#allocation6], 1 }
 0x2c2   :  { %671 = vsyncpa [#allocation9], 1 }
 0x2c3   :  { %672 = vsyncpa [#allocation4], 1 }

</bundles_post_ra>
